<compile_context>
chip_gen: v7x
topology: tpu7x:2x2x1
jax: 0.10.0
libtpu: 0.0.40
codegen_flags: <defaults>
</compile_context>

<pallas_src>
import jax
import jax.numpy as jnp
from jax import lax
from jax.experimental import pallas as pl
from jax.experimental.pallas import tpu as pltpu


def _round_up(n, m):
    return ((n + m - 1) // m) * m


def _make_kernel(sub_rows, n_sub):
    """Kernel over one (TB, I) row tile, processed in `n_sub` sub-blocks."""

    def kernel(x_ref, w1_ref, b1_ref, w2_ref, b2_ref, w3_ref, b3_ref, out_ref):
        # Weights/biases are tiny (H=32): load once per grid step.
        w1 = w1_ref[...]
        b1 = b1_ref[...]
        w2 = w2_ref[...]
        b2 = b2_ref[...]
        w3 = w3_ref[...]
        b3 = b3_ref[...]

        def body(s, carry):
            r = pl.multiple_of(s * sub_rows, sub_rows)
            x = x_ref[pl.ds(r, sub_rows), :]                       # (sub, I) f32

            h1 = jnp.dot(x, w1, preferred_element_type=jnp.float32) + b1
            h1 = jnp.maximum(h1, 0.01 * h1)                        # leaky_relu

            h2 = jnp.dot(h1, w2, preferred_element_type=jnp.float32) + b2
            h2 = jnp.maximum(h2, 0.01 * h2)

            q = jnp.dot(h2, w3, preferred_element_type=jnp.float32) + b3
            out_ref[pl.ds(r, sub_rows), :] = q.astype(out_ref.dtype)
            return carry

        lax.fori_loop(0, n_sub, body, 0, unroll=True)

    return kernel


def value_model_forward(x, params, *, block_rows=1024, sub_rows=256):
    """Forward pass of ValueModel.

    x: [B, n_inp_dim] float32
    params: dict with w1 [I,H], b1 [1,H], w2 [H,H], b2 [1,H], w3 [H,A], b3 [1,A]
    returns: q-values [B, n_actions] float32
    """
    w1, b1 = params["w1"], params["b1"]
    w2, b2 = params["w2"], params["b2"]
    w3, b3 = params["w3"], params["b3"]

    B, I = x.shape
    A = w3.shape[1]

    # --- row tiling ---------------------------------------------------------
    # Small batch: one tile, no inner splitting beyond a single sub-block.
    # Large batch: tile is a multiple of sub_rows and chosen so the grid has
    # at least 2 steps (keeps both TensorCores busy on v7x megacore).
    if B <= sub_rows:
        TB = _round_up(B, 8)
    else:
        half = _round_up(-(-B // 2), sub_rows)          # ceil(B/2) -> sub mult
        TB = min(_round_up(block_rows, sub_rows), half)
    B_pad = _round_up(B, TB)
    xp = x if B_pad == B else jnp.pad(x, ((0, B_pad - B), (0, 0)))

    sub = min(sub_rows, TB)
    n_sub = TB // sub
    kernel = _make_kernel(sub, n_sub)

    grid = (B_pad // TB,)

    # Weights/biases: constant index_map -> fetched once, VMEM-resident.
    def resident(arr):
        return pl.BlockSpec(arr.shape, lambda i: (0, 0))

    out = pl.pallas_call(
        kernel,
        out_shape=jax.ShapeDtypeStruct((B_pad, A), jnp.float32),
        grid=grid,
        in_specs=[
            pl.BlockSpec((TB, I), lambda i: (i, 0)),    # x: streamed by rows
            resident(w1), resident(b1),
            resident(w2), resident(b2),
            resident(w3), resident(b3),
        ],
        out_specs=pl.BlockSpec((TB, A), lambda i: (i, 0)),   # narrow f32 store
        compiler_params=pltpu.CompilerParams(
            dimension_semantics=("parallel",)),
    )(xp, w1, b1, w2, b2, w3, b3)

    return out if B_pad == B else out[:B]


def init_params(key, n_inp_dim, n_hidden_dim, n_actions):
    """Deterministic init mimicking nn.Linear's uniform(-1/sqrt(fan_in), ...)."""
    ks = jax.random.split(key, 6)

    def lin(kw, kb, fan_in, fan_out):
        bound = 1.0 / jnp.sqrt(jnp.float32(fan_in))
        w = jax.random.uniform(kw, (fan_in, fan_out), jnp.float32,
                               minval=-bound, maxval=bound)
        b = jax.random.uniform(kb, (1, fan_out), jnp.float32,
                               minval=-bound, maxval=bound)
        return w, b

    w1, b1 = lin(ks[0], ks[1], n_inp_dim, n_hidden_dim)
    w2, b2 = lin(ks[2], ks[3], n_hidden_dim, n_hidden_dim)
    w3, b3 = lin(ks[4], ks[5], n_hidden_dim, n_actions)
    return {"w1": w1, "b1": b1, "w2": w2, "b2": b2, "w3": w3, "b3": b3}


def reference_forward(x, p):
    def lrelu(v):
        return jnp.where(v >= 0, v, 0.01 * v)
    h1 = lrelu(x @ p["w1"] + p["b1"])
    h2 = lrelu(h1 @ p["w2"] + p["b2"])
    return h2 @ p["w3"] + p["b3"]


if __name__ == "__main__":
    # Config-implied small shapes: batch=8, n_inp_dim=16, n_hidden_dim=32, n_actions=4
    B, I, H, A = 8, 16, 32, 4

    key = jax.random.PRNGKey(0)
    k_x, k_p, k_big = jax.random.split(key, 3)

    x = jax.random.normal(k_x, (B, I), jnp.float32)
    params = init_params(k_p, I, H, A)

    q = jax.block_until_ready(value_model_forward(x, params))
    q_ref = reference_forward(x, params)
    assert q.shape == (B, A)
    # f32 MXU operands throughout -> tight tolerance vs the f32 reference.
    assert jnp.allclose(q, q_ref, atol=5e-3, rtol=5e-3), "mismatch vs reference"

    # Larger, non-tile-aligned batch exercises the >=2-step grid + padding path.
    B_big = 1000
    x_big = jax.random.normal(k_big, (B_big, I), jnp.float32)
    q_big = jax.block_until_ready(value_model_forward(x_big, params))
    q_big_ref = reference_forward(x_big, params)
    assert q_big.shape == (B_big, A)
    assert jnp.allclose(q_big, q_big_ref, atol=5e-3, rtol=5e-3), \
        "mismatch vs reference (large batch)"

    print("KERNEL_OK")
</pallas_src>

<mosaic_0001>
module attributes {stable_mosaic.version = 11 : i64} {
  func.func @kernel(%arg0: i32, %arg1: memref<8x16xf32, #tpu.memory_space<vmem>>, %arg2: memref<16x32xf32, #tpu.memory_space<vmem>>, %arg3: memref<1x32xf32, #tpu.memory_space<vmem>>, %arg4: memref<32x32xf32, #tpu.memory_space<vmem>>, %arg5: memref<1x32xf32, #tpu.memory_space<vmem>>, %arg6: memref<32x4xf32, #tpu.memory_space<vmem>>, %arg7: memref<1x4xf32, #tpu.memory_space<vmem>>, %arg8: memref<8x4xf32, #tpu.memory_space<vmem>>) attributes {dimension_semantics = [#tpu.dimension_semantics<parallel>], iteration_bounds = array<i64: 1>, scalar_prefetch = 0 : i64, scratch_operands = 0 : i64, tpu.core_type = #tpu.core_type<tc>, window_params = [{transform_indices = @transform_0, window_bounds = array<i64: 8, 16>}, {pipeline_mode = #tpu.pipeline_mode<synchronous>, transform_indices = @transform_1, window_bounds = array<i64: 16, 32>}, {pipeline_mode = #tpu.pipeline_mode<synchronous>, transform_indices = @transform_2, window_bounds = array<i64: 1, 32>}, {pipeline_mode = #tpu.pipeline_mode<synchronous>, transform_indices = @transform_3, window_bounds = array<i64: 32, 32>}, {pipeline_mode = #tpu.pipeline_mode<synchronous>, transform_indices = @transform_4, window_bounds = array<i64: 1, 32>}, {pipeline_mode = #tpu.pipeline_mode<synchronous>, transform_indices = @transform_5, window_bounds = array<i64: 32, 4>}, {pipeline_mode = #tpu.pipeline_mode<synchronous>, transform_indices = @transform_6, window_bounds = array<i64: 1, 4>}, {transform_indices = @transform_7, window_bounds = array<i64: 8, 4>}]} {
    %c0 = arith.constant 0 : index
    %c0_0 = arith.constant 0 : index
    %0 = vector.load %arg2[%c0, %c0_0] : memref<16x32xf32, #tpu.memory_space<vmem>>, vector<16x32xf32>
    %c0_1 = arith.constant 0 : index
    %c0_2 = arith.constant 0 : index
    %1 = vector.load %arg3[%c0_1, %c0_2] : memref<1x32xf32, #tpu.memory_space<vmem>>, vector<1x32xf32>
    %c0_3 = arith.constant 0 : index
    %c0_4 = arith.constant 0 : index
    %2 = vector.load %arg4[%c0_3, %c0_4] : memref<32x32xf32, #tpu.memory_space<vmem>>, vector<32x32xf32>
    %c0_5 = arith.constant 0 : index
    %c0_6 = arith.constant 0 : index
    %3 = vector.load %arg5[%c0_5, %c0_6] : memref<1x32xf32, #tpu.memory_space<vmem>>, vector<1x32xf32>
    %c0_7 = arith.constant 0 : index
    %c0_8 = arith.constant 0 : index
    %4 = vector.load %arg6[%c0_7, %c0_8] : memref<32x4xf32, #tpu.memory_space<vmem>>, vector<32x4xf32>
    %c0_9 = arith.constant 0 : index
    %c0_10 = arith.constant 0 : index
    %5 = vector.load %arg7[%c0_9, %c0_10] : memref<1x4xf32, #tpu.memory_space<vmem>>, vector<1x4xf32>
    %c0_i32 = arith.constant 0 : i32
    %c8_i32 = arith.constant 8 : i32
    %6 = arith.muli %c0_i32, %c8_i32 : i32
    %7 = tpu.assume_multiple %6, 8 : i32
    %8 = arith.index_cast %7 : i32 to index
    %c0_11 = arith.constant 0 : index
    %9 = vector.load %arg1[%8, %c0_11] : memref<8x16xf32, #tpu.memory_space<vmem>>, vector<8x16xf32>
    %cst = arith.constant dense<0.000000e+00> : vector<8x32xf32>
    %10 = tpu.matmul %9, %0, %cst {dimension_numbers = #tpu.dot_dimension_numbers<[1], [0], [0], [1], [0, 0, 1, 1], [], []>} : vector<8x16xf32>, vector<16x32xf32>, vector<8x32xf32> -> vector<8x32xf32>
    %11 = vector.broadcast %1 : vector<1x32xf32> to vector<8x32xf32>
    %12 = arith.addf %10, %11 : vector<8x32xf32>
    %cst_12 = arith.constant 0.00999999977 : f32
    %13 = vector.broadcast %cst_12 : f32 to vector<8x32xf32>
    %14 = arith.mulf %13, %12 : vector<8x32xf32>
    %15 = arith.maximumf %12, %14 : vector<8x32xf32>
    %cst_13 = arith.constant dense<0.000000e+00> : vector<8x32xf32>
    %16 = tpu.matmul %15, %2, %cst_13 {dimension_numbers = #tpu.dot_dimension_numbers<[1], [0], [0], [1], [0, 0, 1, 1], [], []>} : vector<8x32xf32>, vector<32x32xf32>, vector<8x32xf32> -> vector<8x32xf32>
    %17 = vector.broadcast %3 : vector<1x32xf32> to vector<8x32xf32>
    %18 = arith.addf %16, %17 : vector<8x32xf32>
    %cst_14 = arith.constant 0.00999999977 : f32
    %19 = vector.broadcast %cst_14 : f32 to vector<8x32xf32>
    %20 = arith.mulf %19, %18 : vector<8x32xf32>
    %21 = arith.maximumf %18, %20 : vector<8x32xf32>
    %cst_15 = arith.constant dense<0.000000e+00> : vector<8x4xf32>
    %22 = tpu.matmul %21, %4, %cst_15 {dimension_numbers = #tpu.dot_dimension_numbers<[1], [0], [0], [1], [0, 0, 1, 1], [], []>} : vector<8x32xf32>, vector<32x4xf32>, vector<8x4xf32> -> vector<8x4xf32>
    %23 = vector.broadcast %5 : vector<1x4xf32> to vector<8x4xf32>
    %24 = arith.addf %22, %23 : vector<8x4xf32>
    %25 = arith.index_cast %7 : i32 to index
    %c0_16 = arith.constant 0 : index
    %26 = vector.load %arg8[%25, %c0_16] : memref<8x4xf32, #tpu.memory_space<vmem>>, vector<8x4xf32>
    tpu.vector_store %arg8[%25, %c0_16], %24 {strides = array<i32>} : memref<8x4xf32, #tpu.memory_space<vmem>>, vector<8x4xf32>,
    %c1_i32 = arith.constant 1 : i32
    return
  }
  func.func @transform_0(%arg0: i32) -> (i32, i32) {
    %c0_i32 = arith.constant 0 : i32
    %c0_i32_0 = arith.constant 0 : i32
    return %arg0, %c0_i32 : i32, i32
  }
  func.func @transform_1(%arg0: i32) -> (i32, i32) {
    %c0_i32 = arith.constant 0 : i32
    %c0_i32_0 = arith.constant 0 : i32
    %c0_i32_1 = arith.constant 0 : i32
    return %c0_i32, %c0_i32_0 : i32, i32
  }
  func.func @transform_2(%arg0: i32) -> (i32, i32) {
    %c0_i32 = arith.constant 0 : i32
    %c0_i32_0 = arith.constant 0 : i32
    %c0_i32_1 = arith.constant 0 : i32
    return %c0_i32, %c0_i32_0 : i32, i32
  }
  func.func @transform_3(%arg0: i32) -> (i32, i32) {
    %c0_i32 = arith.constant 0 : i32
    %c0_i32_0 = arith.constant 0 : i32
    %c0_i32_1 = arith.constant 0 : i32
    return %c0_i32, %c0_i32_0 : i32, i32
  }
  func.func @transform_4(%arg0: i32) -> (i32, i32) {
    %c0_i32 = arith.constant 0 : i32
    %c0_i32_0 = arith.constant 0 : i32
    %c0_i32_1 = arith.constant 0 : i32
    return %c0_i32, %c0_i32_0 : i32, i32
  }
  func.func @transform_5(%arg0: i32) -> (i32, i32) {
    %c0_i32 = arith.constant 0 : i32
    %c0_i32_0 = arith.constant 0 : i32
    %c0_i32_1 = arith.constant 0 : i32
    return %c0_i32, %c0_i32_0 : i32, i32
  }
  func.func @transform_6(%arg0: i32) -> (i32, i32) {
    %c0_i32 = arith.constant 0 : i32
    %c0_i32_0 = arith.constant 0 : i32
    %c0_i32_1 = arith.constant 0 : i32
    return %c0_i32, %c0_i32_0 : i32, i32
  }
  func.func @transform_7(%arg0: i32) -> (i32, i32) {
    %c0_i32 = arith.constant 0 : i32
    %c0_i32_0 = arith.constant 0 : i32
    return %arg0, %c0_i32 : i32, i32
  }
}

</mosaic_0001>

<bundles_post_ra>
// kernel: tpu_custom_call.1
= control target key start
LH: loop header
LB: loop body
LE: loop exit
PB: predicated region body
PF: predicated region fallthrough
CT: control target
= control target key end

     0   :  { %12 = vsyncpa [#allocation3], 0  ;;  %s397_s24 = smov [#allocation2]   ;;  %s496_s0 = inlined_call_operand.vmem [shape: f32[8,16], index: 0, kind: input, shape index: {}]   ;;  %s497_s1 = inlined_call_operand.hbm [shape: f32[16,32], index: 1, kind: input, shape index: {}]   ;;  %s498_s2 = inlined_call_operand.vmem [shape: f32[1,32], index: 2, kind: input, shape index: {}]   ;;  %s499_s3 = inlined_call_operand.vmem [shape: f32[32,32], index: 3, kind: input, shape index: {}]   ;;  %s500_s4 = inlined_call_operand.vmem [shape: f32[1,32], index: 4, kind: input, shape index: {}]   ;;  %s501_s5 = inlined_call_operand.vmem [shape: f32[32,4], index: 5, kind: input, shape index: {}]   ;;  %s502_s6 = inlined_call_operand.vmem [shape: f32[1,4], index: 6, kind: input, shape index: {}]   ;;  %s503_s7 = inlined_call_operand.vmem [shape: f32[8,4], index: 7, kind: output, shape index: {}]  }
   0x1   :  { %s20_s25 = sshll.u32 %s397_s24, 4  ;;  %s373_s28 = scalar_lea.hbm %s497_s1, 256  ;;  %s21_s25 = int_to_ptr.vmem [resolvable:$true] %s20_s25 }
   0x2   :  { %p374_p0 = scmp.ne.s32.totalorder %s497_s1, %s373_s28  ;;  %p377_p1 = scmp.lt.u32.totalorder %s373_s28, %s497_s1 }
   0x4   :  { %p379_p2 = pnand %p377_p1, %p374_p0 }
   0x6   :  { %382 = shalt.err (!%p379_p2)
}
   0x7   :  { %s383_s10 = scalar_lea.vmem %s21_s25, 256  ;;  %p388_p4 = scmp.lt.s32.totalorder %s21_s25, %s21_s25 }
   0x8   :  { %p384_p3 = scmp.ne.s32.totalorder %s21_s25, %s383_s10  ;;  %p389_p5 = scmp.lt.s32.totalorder %s383_s10, %s383_s10 }
   0xa   :  { %p390_p6 = por %p389_p5, %p388_p4 }
   0xc   :  { %p391_p7 = pnand %p390_p6, %p384_p3 }
   0xe   :  { %394 = shalt.err (!%p391_p7)
}
   0xf   :  { %s398_s11 = smov 128   ;;  %s399_s12 = smov 8  }
  0x10   :  { %26 = dma.hbm_to_vmem [thread:$0]  %s497_s1, 256, %s21_s25, [#allocation3], %s398_s11, %s398_s11, %s399_s12  }
  0x11   :  { %395 = dma.done.wait [#allocation3], 256  }
  0x12   :  { %396 = vsyncadd [#allocation3], 4294967040  ;;  %v400_v0 = vmov 0.0|0.0   ;;  %vm401_vm0 = vmmov 0   ;;  %v402_v1 = vmov 0.0   ;;  %v40_v2 = vld [vmem:[#allocation2] sm:$0xff] }
  0x13   :  { %352 = vmatprep.subr.bf16.mxu0 %v400_v0  ;;  %327 = vmatprep.mubr.msk.f32.mxu0 %vm401_vm0, %v402_v1  ;;  %v41_v3 = vld [vmem:[#allocation2 + $0x8] sm:$0xff]  ;;  %v53_v5 = vld [vmem:[%s496_s0] sm:$0xff]  ;;  %vm60_vm1 = vcmask 130048   ;;  %v45_v9 = vld [vmem:[%s499_s3 + $0x10] sm:$0xff]  ;;  %vm142_vm2 = vcmask 261120   ;;  %vm297_vm3 = vcmask 31744  }
  0x14   :  { %355 = vmatprep.subr.bf16.mxu1 %v400_v0  ;;  %338 = vmatprep.mubr.msk.f32.mxu1 %vm401_vm0, %v402_v1  ;;  %v353_v4 = vpack.c.bf16 %v41_v3, %v40_v2  ;;  %v43_v6 = vld [vmem:[%s499_s3] sm:$0xff]  ;;  %v44_v7 = vld [vmem:[%s499_s3 + $0x8] sm:$0xff]  ;;  %v46_v10 = vld [vmem:[%s499_s3 + $0x18] sm:$0xff] }
  0x15   :  { %v356_v8 = vpack.c.bf16 %v44_v7, %v43_v6  ;;  %v359_v11 = vpack.c.bf16 %v46_v10, %v45_v9  ;;  %v304_v12 = vld [vmem:[%s498_s2] ss:$0 sm:$0xff]  ;;  %v49_v19 = vld [vmem:[%s501_s5 + $0x8] sm:$0xff]  ;;  %v50_v21 = vld [vmem:[%s501_s5 + $0x10] sm:$0xff] }
  0x16   :  { %354 = vmatpush3.bf16.msra.mxu0 %v353_v4  ;;  %v48_v18 = vld [vmem:[%s501_s5] sm:$0xff]  ;;  %v51_v22 = vld [vmem:[%s501_s5 + $0x18] sm:$0xff] }
  0x17   :  { %361 = vmatprep.subr.bf16.mxu0 %v400_v0  ;;  %357 = vmatpush3.bf16.msra.mxu1 %v356_v8  ;;  %v362_v20 = vpack.c.bf16 %v49_v19, %v48_v18  ;;  %v365_v23 = vpack.c.bf16 %v51_v22, %v50_v21  ;;  %v306_v24 = vld [vmem:[%s500_s4] ss:$0 sm:$0xff] }
  0x18   :  { %358 = vmatprep.subr.bf16.mxu1 %v400_v0  ;;  %v308_v30 = vld [vmem:[%s502_s6] ss:$0 sm:$0xff] }
  0x19   :  { %328 = vmatmul.mubr.msk.f32.vlgmr.msra.gmra.mrb[0].mxu0 %vm60_vm1, %v53_v5 }
  0x1a   :  { %349 = vmatprep.mubr.msk.f32.mxu0 %vm401_vm0, %v402_v1  ;;  %363 = vmatpush3.bf16.msra.mxu0 %v362_v20 }
  0x1b   :  { %360 = vmatpush3.bf16.msra.mxu1 %v359_v11  ;;  %364 = vmatprep.subr.bf16.mxu0 %v400_v0 }
  0x1e   :  { %366 = vmatpush3.bf16.msra.mxu0 %v365_v23 }
  0xec   :  { %v130_v13 = vpop.f32.mrb[0].mxu0 }
  0xed   :  { %v131_v14 = vadd.f32 %v304_v12, %v130_v13  ;;  %v329_v15 = vpop.f32.mrb[1].mxu0 }
  0xef   :  { %v134_v16 = vmul.f32 0.01, %v131_v14 }
  0xf1   :  { %v135_v17 = vmax.f32 %v131_v14, %v134_v16 }
  0xf3   :  { %339 = vmatmul.mubr.msk.f32.vlgmr.msra.gmra.mrb[0].mxu1 %vm142_vm2, %v135_v17 }
 0x1c6   :  { %v212_v25 = vpop.f32.mrb[0].mxu1 }
 0x1c7   :  { %v213_v26 = vadd.f32 %v306_v24, %v212_v25  ;;  %v340_v27 = vpop.f32.mrb[1].mxu1 }
 0x1c9   :  { %v216_v28 = vmul.f32 0.01, %v213_v26 }
 0x1cb   :  { %v217_v29 = vmax.f32 %v213_v26, %v216_v28 }
 0x1cd   :  { %350 = vmatmul.mubr.msk.f32.vlgmr.msra.gmra.mrb[2].mxu0 %vm142_vm2, %v217_v29 }
 0x2a0   :  { %v293_v31 = vpop.f32.mrb[2].mxu0 }
 0x2a1   :  { %v294_v32 = vadd.f32 %v308_v30, %v293_v31  ;;  %v351_v33 = vpop.f32.mrb[3].mxu0 }
 0x2a3   :  { %298 = vst.msk [vmem:[%s503_s7] sm:$0xff] %vm297_vm3, %v294_v32 }
 0x2a4   :  { %303 = vsyncpa [#allocation3], 1 }

</bundles_post_ra>
